<compile_context>
chip_gen: v7x
topology: tpu7x:2x2x1
jax: 0.10.0
libtpu: 0.0.40
codegen_flags: <defaults>
</compile_context>

<pallas_src>
import functools

import jax
import jax.numpy as jnp
from jax import lax
from jax.experimental import pallas as pl
from jax.experimental.pallas import tpu as pltpu


def _round_up(x, m):
    return -(-x // m) * m


def _drl_kernel(x_ref, xl_ref, xr_ref, mask_ref, w3_ref, b3_ref, w1_ref, b1_ref,
                out_ref, lstrip_ref, rstrip_ref, *, dilation, halo, t_blk):
    """One (batch, time-tile) grid step.

    x_ref    : (1, C_in, T_BLK)     center tile of x
    xl_ref   : (1, C_in, HALO)      HALO columns just left of the tile (clamped at edge)
    xr_ref   : (1, C_in, HALO)      HALO columns just right of the tile (clamped at edge)
    mask_ref : (1, 1, T_BLK)        mask[:, 0:1, :] tile
    w3_ref   : (C_out, 3*C_in)      dilated-conv weight, taps flattened into K
    b3_ref   : (C_out, 1)           f32
    w1_ref   : (C_out, C_out)       1x1 conv
    b1_ref   : (C_out, 1)           f32
    out_ref  : (1, C_out, T_BLK)
    lstrip_ref / rstrip_ref : (C_in, 2*HALO) VMEM junction strips (left / right tile edge)
    """
    d = dilation
    j = pl.program_id(1)
    nt = pl.num_programs(1)
    c_in = x_ref.shape[1]

    # Junction strips: [left halo | first HALO cols of tile] and
    #                  [last HALO cols of tile | right halo].  Lane-aligned stores only.
    lstrip_ref[:, 0:halo] = xl_ref[0]
    lstrip_ref[:, halo:2 * halo] = x_ref[0, :, 0:halo]
    rstrip_ref[:, 0:halo] = x_ref[0, :, t_blk - halo:t_blk]
    rstrip_ref[:, halo:2 * halo] = xr_ref[0]

    # Conv1d zero padding at the sequence boundaries: zero only the d columns the taps
    # actually consume, and only on boundary tiles.
    @pl.when(j == 0)
    def _():
        lstrip_ref[:, halo - d:halo] = jnp.zeros((c_in, d), lstrip_ref.dtype)

    @pl.when(j == nt - 1)
    def _():
        rstrip_ref[:, halo:halo + d] = jnp.zeros((c_in, d), rstrip_ref.dtype)

    xc = x_ref[0]                                     # tap k=1 : x[t]

    # Taps k=0 / k=2 (x[t-d] / x[t+d]): bulk comes straight from the pipelined x block;
    # only the halo-wide junction piece is read from the small strip.  Both concat pieces
    # are multiples of 128 lanes wide -> 128-aligned lane concatenation.
    if t_blk > halo:
        left_tap = jnp.concatenate(
            [lstrip_ref[:, halo - d:2 * halo - d],
             x_ref[0, :, halo - d:t_blk - d]], axis=1)
        right_tap = jnp.concatenate(
            [x_ref[0, :, d:t_blk - halo + d],
             rstrip_ref[:, d:halo + d]], axis=1)
    else:  # t_blk == halo: the strips already span the whole tile
        left_tap = lstrip_ref[:, halo - d:2 * halo - d]
        right_tap = rstrip_ref[:, d:halo + d]

    # Stack the 3 taps along the contraction dim -> single MXU matmul with K = 3*C_in.
    x3 = jnp.concatenate([left_tap, xc, right_tap], axis=0)   # (3*C_in, T_BLK)
    x3 = x3.astype(w3_ref.dtype)                              # f32 or bf16 MXU operand

    h = jnp.dot(w3_ref[...], x3, preferred_element_type=jnp.float32) + b3_ref[...]
    h = jnp.maximum(h, 0.0)                                   # ReLU
    h = h.astype(w1_ref.dtype)

    y = jnp.dot(w1_ref[...], h, preferred_element_type=jnp.float32) + b1_ref[...]

    # TODO(synk): nn.Dropout is identity in eval mode; training-mode (stochastic) dropout
    # is intentionally not applied here.
    out_ref[0] = ((xc + y) * mask_ref[0]).astype(out_ref.dtype)


def _estimate_tile_vmem(t_blk, halo, c_in, c_out, x_isz, cd_isz):
    """Rough per-step VMEM working set (double-buffered pipeline blocks + temporaries)."""
    return (2 * c_in * t_blk * x_isz              # x center tile (x2 buffers)
            + 2 * 2 * c_in * halo * x_isz         # left/right halo blocks (x2 buffers)
            + 2 * 1 * t_blk * x_isz               # mask tile (x2)
            + 2 * c_out * t_blk * x_isz           # output tile (x2)
            + 2 * c_in * 2 * halo * x_isz         # junction strips
            + 3 * c_in * t_blk * cd_isz           # x3 matmul operand
            + 2 * c_out * t_blk * 4               # h, y (f32)
            + 2 * (3 * c_in * c_out + c_out * c_out + 2 * c_out) * 4)  # weights (x2)


def _pick_t_blk(t_padded, halo, c_in, c_out, x_isz, cd_isz, budget, max_t_blk=None):
    """Largest lane-dense tile (multiple of halo) under the VMEM budget, preferring
    t_blk >= 8*halo (halo amortization) and exact divisors of the padded length."""
    cap = min(t_padded, max(32 * halo, 4096))
    if max_t_blk is not None:
        cap = min(cap, max_t_blk)
    cap = max(cap, halo)
    cands = [m * halo for m in range(1, cap // halo + 1)]
    cands = [c for c in cands
             if _estimate_tile_vmem(c, halo, c_in, c_out, x_isz, cd_isz) <= budget]
    if not cands:
        cands = [halo]

    def choose(pool):
        divs = [c for c in pool if t_padded % c == 0]
        if divs:
            return max(divs)
        ok = [c for c in pool
              if _round_up(t_padded, c) - t_padded <= max(halo, t_padded // 8)]
        if ok:
            return max(ok)
        return None

    big = [c for c in cands if c >= 8 * halo]
    pick = choose(big) if big else None
    if pick is None:
        pick = choose(cands)
    if pick is None:
        pick = max(cands)
    return pick


def dilated_residual_layer(x, mask, w3, b3, w1, b1, dilation, *,
                           t_blk=None, compute_dtype="auto"):
    """(x + conv_1x1(relu(conv_dilated(x)))) * mask[:, 0:1, :]   (eval-mode dropout).

    x: (N, C, T), mask: (N, Cm, T), w3: (C_out, C_in, 3) PyTorch Conv1d layout,
    b3: (C_out,), w1: (C_out, C_out), b1: (C_out,).  Returns (N, C_out, T).
    """
    N, C_in, T = x.shape
    C_out, C_in_w, K = w3.shape
    assert K == 3 and C_in_w == C_in
    assert C_out == C_in, "residual x + out requires in_channels == out_channels"
    d = int(dilation)
    assert d >= 1

    # Halo: smallest multiple of 128 covering the dilation reach (lane-dense halo DMAs).
    halo = _round_up(max(d, 128), 128)

    # bf16 MXU path only once K = 3*C_in starts filling the MXU contraction depth and the
    # sublane pack (16) divides the channel count; keep f32 for small C (mem-bound,
    # tight accuracy budget).
    if isinstance(compute_dtype, str) and compute_dtype == "auto":
        compute_dtype = jnp.bfloat16 if (C_in >= 128 and C_in % 16 == 0) else None
    x_isz = jnp.dtype(x.dtype).itemsize
    cd_isz = jnp.dtype(compute_dtype).itemsize if compute_dtype is not None else 4

    # Generation-aware budgets: v5e/v6e have 128 MiB VMEM, v7x 64 MiB per TensorCore.
    try:
        vmem_cap = int(getattr(pltpu.get_tpu_info(), "vmem_capacity_bytes", 64 << 20))
    except Exception:
        vmem_cap = 64 << 20
    if vmem_cap >= (100 << 20):        # v5e / v6e
        vmem_limit, tile_budget = 96 << 20, 24 << 20
    else:                              # v7x (or unknown -> conservative)
        vmem_limit, tile_budget = 48 << 20, 14 << 20

    t_padded0 = _round_up(T, halo)
    if t_blk is None:
        t_blk = _pick_t_blk(t_padded0, halo, C_in, C_out, x_isz, cd_isz, tile_budget)
        # Prefer >=2 grid steps so both v7x TensorCores (megacore) get work.
        if N * (-(-t_padded0 // t_blk)) < 2 and t_padded0 >= 2 * halo:
            t_blk = _pick_t_blk(t_padded0, halo, C_in, C_out, x_isz, cd_isz, tile_budget,
                                max_t_blk=_round_up(-(-t_padded0 // 2), halo))
    else:
        t_blk = min(_round_up(max(int(t_blk), halo), halo), t_padded0)
    assert t_blk % halo == 0 and d <= halo <= t_blk

    n_t = -(-t_padded0 // t_blk)
    Tpad = n_t * t_blk

    # Ragged T: zero-pad time to a whole number of tiles (zero pad matches Conv1d's
    # zero padding for the last valid columns); output is sliced back to T.
    # TODO(synk): a masked last tile (in-kernel T bound) would avoid this one-off pad copy.
    mask0 = mask[:, 0:1, :]
    if Tpad != T:
        x_in = jnp.pad(x, ((0, 0), (0, 0), (0, Tpad - T)))
        mask0 = jnp.pad(mask0, ((0, 0), (0, 0), (0, Tpad - T)))
    else:
        x_in = x

    # Flatten the 3 taps into the contraction dim: w3flat[o, k*C_in + i] = w3[o, i, k].
    w3flat = jnp.transpose(w3, (0, 2, 1)).reshape(C_out, 3 * C_in)
    w1c = w1
    if compute_dtype is not None:
        w3flat = w3flat.astype(compute_dtype)
        w1c = w1c.astype(compute_dtype)
    b3c = b3.reshape(C_out, 1).astype(jnp.float32)
    b1c = b1.reshape(C_out, 1).astype(jnp.float32)

    r = t_blk // halo                 # halo-units per time tile
    last_halo = Tpad // halo - 1      # last valid halo-block index

    kernel = functools.partial(_drl_kernel, dilation=d, halo=halo, t_blk=t_blk)

    # Advisory cost estimate (mem-bound kernel) for XLA scheduling of surrounding layers.
    flops = 2 * N * Tpad * (3 * C_in * C_out + C_out * C_out)
    bytes_accessed = (N * Tpad * C_in * x_isz                 # x center
                      + 2 * N * n_t * C_in * halo * x_isz     # halo re-reads
                      + N * Tpad * x_isz                      # mask row
                      + N * Tpad * C_out * x_isz              # output
                      + (3 * C_in * C_out + C_out * C_out + 2 * C_out) * 4)
    cost = pl.CostEstimate(flops=int(flops), transcendentals=0,
                           bytes_accessed=int(bytes_accessed))

    out = pl.pallas_call(
        kernel,
        out_shape=jax.ShapeDtypeStruct((N, C_out, Tpad), x.dtype),
        grid_spec=pltpu.PrefetchScalarGridSpec(
            num_scalar_prefetch=0,
            grid=(N, n_t),
            in_specs=[
                # center tile of x
                pl.BlockSpec((1, C_in, t_blk), lambda b, j: (b, 0, j)),
                # left halo: HALO columns immediately before the tile (clamped at edge)
                pl.BlockSpec((1, C_in, halo),
                             lambda b, j: (b, 0, jnp.maximum(j * r - 1, 0))),
                # right halo: HALO columns immediately after the tile (clamped at edge)
                pl.BlockSpec((1, C_in, halo),
                             lambda b, j: (b, 0, jnp.minimum((j + 1) * r, last_halo))),
                # mask[:, 0:1, :]
                pl.BlockSpec((1, 1, t_blk), lambda b, j: (b, 0, j)),
                # weights / biases: constant index_map -> fetched once, kept resident
                pl.BlockSpec((C_out, 3 * C_in), lambda b, j: (0, 0)),
                pl.BlockSpec((C_out, 1), lambda b, j: (0, 0)),
                pl.BlockSpec((C_out, C_out), lambda b, j: (0, 0)),
                pl.BlockSpec((C_out, 1), lambda b, j: (0, 0)),
            ],
            out_specs=pl.BlockSpec((1, C_out, t_blk), lambda b, j: (b, 0, j)),
            scratch_shapes=[pltpu.VMEM((C_in, 2 * halo), x.dtype),
                            pltpu.VMEM((C_in, 2 * halo), x.dtype)],
        ),
        compiler_params=pltpu.CompilerParams(
            dimension_semantics=("parallel", "parallel"),
            vmem_limit_bytes=vmem_limit),
        cost_estimate=cost,
    )(x_in, x_in, x_in, mask0, w3flat, b3c, w1c, b1c)

    if Tpad != T:
        out = out[:, :, :T]
    return out


def _reference(x, mask, w3, b3, w1, b1, dilation):
    """Plain-JAX reference (eval-mode dropout = identity). w3: (C_out, C_in, 3)."""
    out = lax.conv_general_dilated(
        x, w3, window_strides=(1,), padding=[(dilation, dilation)],
        rhs_dilation=(dilation,), dimension_numbers=("NCH", "OIH", "NCH"))
    out = out + b3[None, :, None]
    out = jnp.maximum(out, 0.0)
    out = jnp.einsum("oc,nct->not", w1, out) + b1[None, :, None]
    return (x + out) * mask[:, 0:1, :]


if __name__ == "__main__":
    # Small shapes consistent with the module: Conv1d activations are (N, C, T).
    N, C, T = 2, 8, 512

    key = jax.random.PRNGKey(0)
    k_x, k_m, k_w3, k_b3, k_w1, k_b1 = jax.random.split(key, 6)

    x = jax.random.normal(k_x, (N, C, T), jnp.float32)
    mask = (jax.random.uniform(k_m, (N, C, T)) > 0.3).astype(jnp.float32)

    # Deterministic parameter init (PyTorch-style uniform bounds), in-script.
    bound3 = 1.0 / ((C * 3) ** 0.5)
    w3 = jax.random.uniform(k_w3, (C, C, 3), jnp.float32, -bound3, bound3)
    b3 = jax.random.uniform(k_b3, (C,), jnp.float32, -bound3, bound3)
    bound1 = 1.0 / (C ** 0.5)
    w1 = jax.random.uniform(k_w1, (C, C), jnp.float32, -bound1, bound1)
    b1 = jax.random.uniform(k_b1, (C,), jnp.float32, -bound1, bound1)

    # 1) Multi-tile correctness (interior junctions), t_blk == halo path.
    #    (Small tiles here are for correctness coverage only; the default picker uses
    #     large lane-dense tiles.)
    for dilation in (2, 8):
        out = jax.block_until_ready(
            dilated_residual_layer(x, mask, w3, b3, w1, b1, dilation, t_blk=128))
        ref = _reference(x, mask, w3, b3, w1, b1, dilation)
        assert out.shape == (N, C, T)
        assert float(jnp.max(jnp.abs(out - ref))) < 1e-4

    # 2) Multi-tile, t_blk > halo path (aligned lane-concat taps, interior junctions).
    ref2 = _reference(x, mask, w3, b3, w1, b1, 2)
    out = jax.block_until_ready(
        dilated_residual_layer(x, mask, w3, b3, w1, b1, 2, t_blk=256))
    assert float(jnp.max(jnp.abs(out - ref2))) < 1e-4

    # 3) Auto tile / budget selection path.
    out = jax.block_until_ready(dilated_residual_layer(x, mask, w3, b3, w1, b1, 2))
    assert float(jnp.max(jnp.abs(out - ref2))) < 1e-4

    # 4) Ragged T (exercises the padded last tile).
    Tr = 500
    x_r = x[:, :, :Tr]
    m_r = mask[:, :, :Tr]
    out = jax.block_until_ready(dilated_residual_layer(x_r, m_r, w3, b3, w1, b1, 4))
    ref_r = _reference(x_r, m_r, w3, b3, w1, b1, 4)
    assert out.shape == (N, C, Tr)
    assert float(jnp.max(jnp.abs(out - ref_r))) < 1e-4

    # 5) Explicit bf16 MXU path (f32 accumulation) — documented looser tolerance.
    out = jax.block_until_ready(
        dilated_residual_layer(x, mask, w3, b3, w1, b1, 2, t_blk=256,
                               compute_dtype=jnp.bfloat16))
    assert float(jnp.max(jnp.abs(out - ref2))) < 5e-2

    print("KERNEL_OK")
</pallas_src>

<mosaic_0001>
module attributes {stable_mosaic.version = 11 : i64} {
  func.func @_drl_kernel(%arg0: i32, %arg1: i32, %arg2: memref<1x8x128xf32, #tpu.memory_space<vmem>>, %arg3: memref<1x8x128xf32, #tpu.memory_space<vmem>>, %arg4: memref<1x8x128xf32, #tpu.memory_space<vmem>>, %arg5: memref<1x1x128xf32, #tpu.memory_space<vmem>>, %arg6: memref<8x24xf32, #tpu.memory_space<vmem>>, %arg7: memref<8x1xf32, #tpu.memory_space<vmem>>, %arg8: memref<8x8xf32, #tpu.memory_space<vmem>>, %arg9: memref<8x1xf32, #tpu.memory_space<vmem>>, %arg10: memref<1x8x128xf32, #tpu.memory_space<vmem>>, %arg11: memref<8x256xf32, #tpu.memory_space<vmem>>, %arg12: memref<8x256xf32, #tpu.memory_space<vmem>>) attributes {dimension_semantics = [#tpu.dimension_semantics<parallel>, #tpu.dimension_semantics<parallel>], iteration_bounds = array<i64: 2, 4>, scalar_prefetch = 0 : i64, scratch_operands = 2 : i64, tpu.core_type = #tpu.core_type<tc>, window_params = [{transform_indices = @transform_0, window_bounds = array<i64: 1, 8, 128>}, {transform_indices = @transform_1, window_bounds = array<i64: 1, 8, 128>}, {transform_indices = @transform_2, window_bounds = array<i64: 1, 8, 128>}, {transform_indices = @transform_3, window_bounds = array<i64: 1, 1, 128>}, {pipeline_mode = #tpu.pipeline_mode<synchronous>, transform_indices = @transform_4, window_bounds = array<i64: 8, 24>}, {pipeline_mode = #tpu.pipeline_mode<synchronous>, transform_indices = @transform_5, window_bounds = array<i64: 8, 1>}, {pipeline_mode = #tpu.pipeline_mode<synchronous>, transform_indices = @transform_6, window_bounds = array<i64: 8, 8>}, {pipeline_mode = #tpu.pipeline_mode<synchronous>, transform_indices = @transform_7, window_bounds = array<i64: 8, 1>}, {transform_indices = @transform_8, window_bounds = array<i64: 1, 8, 128>}]} {
    %c0 = arith.constant 0 : index
    %c0_0 = arith.constant 0 : index
    %c0_1 = arith.constant 0 : index
    %0 = vector.load %arg3[%c0, %c0_0, %c0_1] : memref<1x8x128xf32, #tpu.memory_space<vmem>>, vector<1x8x128xf32>
    %1 = vector.shape_cast %0 : vector<1x8x128xf32> to vector<8x128xf32>
    %c0_2 = arith.constant 0 : index
    %c0_3 = arith.constant 0 : index
    %2 = vector.load %arg11[%c0_2, %c0_3] : memref<8x256xf32, #tpu.memory_space<vmem>>, vector<8x128xf32>
    tpu.vector_store %arg11[%c0_2, %c0_3], %1 {strides = array<i32>} : memref<8x256xf32, #tpu.memory_space<vmem>>, vector<8x128xf32>,
    %c0_4 = arith.constant 0 : index
    %c0_5 = arith.constant 0 : index
    %c0_6 = arith.constant 0 : index
    %3 = vector.load %arg2[%c0_4, %c0_5, %c0_6] : memref<1x8x128xf32, #tpu.memory_space<vmem>>, vector<1x8x128xf32>
    %4 = vector.shape_cast %3 : vector<1x8x128xf32> to vector<8x128xf32>
    %c0_7 = arith.constant 0 : index
    %c128 = arith.constant 128 : index
    %5 = vector.load %arg11[%c0_7, %c128] : memref<8x256xf32, #tpu.memory_space<vmem>>, vector<8x128xf32>
    tpu.vector_store %arg11[%c0_7, %c128], %4 {strides = array<i32>} : memref<8x256xf32, #tpu.memory_space<vmem>>, vector<8x128xf32>,
    %c0_8 = arith.constant 0 : index
    %c0_9 = arith.constant 0 : index
    %c0_10 = arith.constant 0 : index
    %6 = vector.load %arg2[%c0_8, %c0_9, %c0_10] : memref<1x8x128xf32, #tpu.memory_space<vmem>>, vector<1x8x128xf32>
    %7 = vector.shape_cast %6 : vector<1x8x128xf32> to vector<8x128xf32>
    %c0_11 = arith.constant 0 : index
    %c0_12 = arith.constant 0 : index
    %8 = vector.load %arg12[%c0_11, %c0_12] : memref<8x256xf32, #tpu.memory_space<vmem>>, vector<8x128xf32>
    tpu.vector_store %arg12[%c0_11, %c0_12], %7 {strides = array<i32>} : memref<8x256xf32, #tpu.memory_space<vmem>>, vector<8x128xf32>,
    %c0_13 = arith.constant 0 : index
    %c0_14 = arith.constant 0 : index
    %c0_15 = arith.constant 0 : index
    %9 = vector.load %arg4[%c0_13, %c0_14, %c0_15] : memref<1x8x128xf32, #tpu.memory_space<vmem>>, vector<1x8x128xf32>
    %10 = vector.shape_cast %9 : vector<1x8x128xf32> to vector<8x128xf32>
    %c0_16 = arith.constant 0 : index
    %c128_17 = arith.constant 128 : index
    %11 = vector.load %arg12[%c0_16, %c128_17] : memref<8x256xf32, #tpu.memory_space<vmem>>, vector<8x128xf32>
    tpu.vector_store %arg12[%c0_16, %c128_17], %10 {strides = array<i32>} : memref<8x256xf32, #tpu.memory_space<vmem>>, vector<8x128xf32>,
    %c0_i32 = arith.constant 0 : i32
    %12 = arith.cmpi eq, %arg1, %c0_i32 : i32
    %13 = arith.extui %12 : i1 to i32
    %c0_i32_18 = arith.constant 0 : i32
    %14 = arith.cmpi ne, %13, %c0_i32_18 : i32
    scf.if %14 {
      %cst_41 = arith.constant 0.000000e+00 : f32
      %43 = vector.broadcast %cst_41 : f32 to vector<8x2xf32>
      %c0_42 = arith.constant 0 : index
      %c126_43 = arith.constant 126 : index
      %44 = vector.load %arg11[%c0_42, %c126_43] : memref<8x256xf32, #tpu.memory_space<vmem>>, vector<8x2xf32>
      tpu.vector_store %arg11[%c0_42, %c126_43], %43 {strides = array<i32>} : memref<8x256xf32, #tpu.memory_space<vmem>>, vector<8x2xf32>,
    } else {
    }
    %c3_i32 = arith.constant 3 : i32
    %15 = arith.cmpi eq, %arg1, %c3_i32 : i32
    %16 = arith.extui %15 : i1 to i32
    %c0_i32_19 = arith.constant 0 : i32
    %17 = arith.cmpi ne, %16, %c0_i32_19 : i32
    scf.if %17 {
      %cst_41 = arith.constant 0.000000e+00 : f32
      %43 = vector.broadcast %cst_41 : f32 to vector<8x2xf32>
      %c0_42 = arith.constant 0 : index
      %c128_43 = arith.constant 128 : index
      %44 = vector.load %arg12[%c0_42, %c128_43] : memref<8x256xf32, #tpu.memory_space<vmem>>, vector<8x2xf32>
      tpu.vector_store %arg12[%c0_42, %c128_43], %43 {strides = array<i32>} : memref<8x256xf32, #tpu.memory_space<vmem>>, vector<8x2xf32>,
    } else {
    }
    %c0_20 = arith.constant 0 : index
    %c0_21 = arith.constant 0 : index
    %c0_22 = arith.constant 0 : index
    %18 = vector.load %arg2[%c0_20, %c0_21, %c0_22] : memref<1x8x128xf32, #tpu.memory_space<vmem>>, vector<1x8x128xf32>
    %19 = vector.shape_cast %18 : vector<1x8x128xf32> to vector<8x128xf32>
    %c0_23 = arith.constant 0 : index
    %c126 = arith.constant 126 : index
    %20 = vector.load %arg11[%c0_23, %c126] : memref<8x256xf32, #tpu.memory_space<vmem>>, vector<8x128xf32>
    %c0_24 = arith.constant 0 : index
    %c2 = arith.constant 2 : index
    %21 = vector.load %arg12[%c0_24, %c2] : memref<8x256xf32, #tpu.memory_space<vmem>>, vector<8x128xf32>
    %22 = tpu.concatenate %20, %19, %21 in 0 : vector<8x128xf32>, vector<8x128xf32>, vector<8x128xf32> -> vector<24x128xf32>
    %c0_25 = arith.constant 0 : index
    %c0_26 = arith.constant 0 : index
    %23 = vector.load %arg6[%c0_25, %c0_26] : memref<8x24xf32, #tpu.memory_space<vmem>>, vector<8x24xf32>
    %cst = arith.constant dense<0.000000e+00> : vector<8x128xf32>
    %24 = tpu.matmul %23, %22, %cst {dimension_numbers = #tpu.dot_dimension_numbers<[1], [0], [0], [1], [0, 0, 1, 1], [], []>} : vector<8x24xf32>, vector<24x128xf32>, vector<8x128xf32> -> vector<8x128xf32>
    %c0_27 = arith.constant 0 : index
    %c0_28 = arith.constant 0 : index
    %25 = vector.load %arg7[%c0_27, %c0_28] : memref<8x1xf32, #tpu.memory_space<vmem>>, vector<8x1xf32>
    %26 = vector.broadcast %25 : vector<8x1xf32> to vector<8x128xf32>
    %27 = arith.addf %24, %26 : vector<8x128xf32>
    %cst_29 = arith.constant 0.000000e+00 : f32
    %28 = vector.broadcast %cst_29 : f32 to vector<8x128xf32>
    %29 = arith.maximumf %27, %28 : vector<8x128xf32>
    %c0_30 = arith.constant 0 : index
    %c0_31 = arith.constant 0 : index
    %30 = vector.load %arg8[%c0_30, %c0_31] : memref<8x8xf32, #tpu.memory_space<vmem>>, vector<8x8xf32>
    %cst_32 = arith.constant dense<0.000000e+00> : vector<8x128xf32>
    %31 = tpu.matmul %30, %29, %cst_32 {dimension_numbers = #tpu.dot_dimension_numbers<[1], [0], [0], [1], [0, 0, 1, 1], [], []>} : vector<8x8xf32>, vector<8x128xf32>, vector<8x128xf32> -> vector<8x128xf32>
    %c0_33 = arith.constant 0 : index
    %c0_34 = arith.constant 0 : index
    %32 = vector.load %arg9[%c0_33, %c0_34] : memref<8x1xf32, #tpu.memory_space<vmem>>, vector<8x1xf32>
    %33 = vector.broadcast %32 : vector<8x1xf32> to vector<8x128xf32>
    %34 = arith.addf %31, %33 : vector<8x128xf32>
    %35 = arith.addf %19, %34 : vector<8x128xf32>
    %c0_35 = arith.constant 0 : index
    %c0_36 = arith.constant 0 : index
    %c0_37 = arith.constant 0 : index
    %36 = vector.load %arg5[%c0_35, %c0_36, %c0_37] : memref<1x1x128xf32, #tpu.memory_space<vmem>>, vector<1x1x128xf32>
    %37 = vector.shape_cast %36 : vector<1x1x128xf32> to vector<1x128xf32>
    %38 = vector.broadcast %37 : vector<1x128xf32> to vector<8x128xf32>
    %39 = arith.mulf %35, %38 : vector<8x128xf32>
    %c0_38 = arith.constant 0 : index
    %c0_39 = arith.constant 0 : index
    %c0_40 = arith.constant 0 : index
    %40 = vector.load %arg10[%c0_38, %c0_39, %c0_40] : memref<1x8x128xf32, #tpu.memory_space<vmem>>, vector<1x8x128xf32>
    %41 = vector.shape_cast %40 : vector<1x8x128xf32> to vector<8x128xf32>
    %42 = vector.shape_cast %39 : vector<8x128xf32> to vector<1x8x128xf32>
    tpu.vector_store %arg10[%c0_38, %c0_39, %c0_40], %42 {strides = array<i32>} : memref<1x8x128xf32, #tpu.memory_space<vmem>>, vector<1x8x128xf32>,
    return
  }
  func.func @transform_0(%arg0: i32, %arg1: i32) -> (i32, i32, i32) {
    %c0_i32 = arith.constant 0 : i32
    %c0_i32_0 = arith.constant 0 : i32
    return %arg0, %c0_i32, %arg1 : i32, i32, i32
  }
  func.func @transform_1(%arg0: i32, %arg1: i32) -> (i32, i32, i32) {
    %c1_i32 = arith.constant 1 : i32
    %0 = arith.muli %arg1, %c1_i32 : i32
    %c1_i32_0 = arith.constant 1 : i32
    %1 = arith.subi %0, %c1_i32_0 : i32
    %c0_i32 = arith.constant 0 : i32
    %2 = arith.maxsi %1, %c0_i32 : i32
    %c0_i32_1 = arith.constant 0 : i32
    %c0_i32_2 = arith.constant 0 : i32
    return %arg0, %c0_i32_1, %2 : i32, i32, i32
  }
  func.func @transform_2(%arg0: i32, %arg1: i32) -> (i32, i32, i32) {
    %c1_i32 = arith.constant 1 : i32
    %0 = arith.addi %arg1, %c1_i32 : i32
    %c1_i32_0 = arith.constant 1 : i32
    %1 = arith.muli %0, %c1_i32_0 : i32
    %c3_i32 = arith.constant 3 : i32
    %2 = arith.minsi %1, %c3_i32 : i32
    %c0_i32 = arith.constant 0 : i32
    %c0_i32_1 = arith.constant 0 : i32
    return %arg0, %c0_i32, %2 : i32, i32, i32
  }
  func.func @transform_3(%arg0: i32, %arg1: i32) -> (i32, i32, i32) {
    %c0_i32 = arith.constant 0 : i32
    %c0_i32_0 = arith.constant 0 : i32
    return %arg0, %c0_i32, %arg1 : i32, i32, i32
  }
  func.func @transform_4(%arg0: i32, %arg1: i32) -> (i32, i32) {
    %c0_i32 = arith.constant 0 : i32
    %c0_i32_0 = arith.constant 0 : i32
    %c0_i32_1 = arith.constant 0 : i32
    return %c0_i32, %c0_i32_0 : i32, i32
  }
  func.func @transform_5(%arg0: i32, %arg1: i32) -> (i32, i32) {
    %c0_i32 = arith.constant 0 : i32
    %c0_i32_0 = arith.constant 0 : i32
    %c0_i32_1 = arith.constant 0 : i32
    return %c0_i32, %c0_i32_0 : i32, i32
  }
  func.func @transform_6(%arg0: i32, %arg1: i32) -> (i32, i32) {
    %c0_i32 = arith.constant 0 : i32
    %c0_i32_0 = arith.constant 0 : i32
    %c0_i32_1 = arith.constant 0 : i32
    return %c0_i32, %c0_i32_0 : i32, i32
  }
  func.func @transform_7(%arg0: i32, %arg1: i32) -> (i32, i32) {
    %c0_i32 = arith.constant 0 : i32
    %c0_i32_0 = arith.constant 0 : i32
    %c0_i32_1 = arith.constant 0 : i32
    return %c0_i32, %c0_i32_0 : i32, i32
  }
  func.func @transform_8(%arg0: i32, %arg1: i32) -> (i32, i32, i32) {
    %c0_i32 = arith.constant 0 : i32
    %c0_i32_0 = arith.constant 0 : i32
    return %arg0, %c0_i32, %arg1 : i32, i32, i32
  }
}

</mosaic_0001>

<bundles_post_ra>
// kernel: tpu_custom_call.1
= control target key start
LH: loop header
LB: loop body
LE: loop exit
PB: predicated region body
PF: predicated region fallthrough
CT: control target
= control target key end

     0   :  { %s1836_s0 = inlined_call_operand.hbm [shape: f32[2,8,512], index: 0, kind: input, shape index: {}]   ;;  %s1837_s1 = inlined_call_operand.hbm [shape: f32[2,8,512], index: 1, kind: input, shape index: {}]   ;;  %s1838_s2 = inlined_call_operand.hbm [shape: f32[2,8,512], index: 2, kind: input, shape index: {}]   ;;  %s1839_s3 = inlined_call_operand.vmem [shape: f32[2,1,512], index: 3, kind: input, shape index: {}]   ;;  %s1840_s4 = inlined_call_operand.vmem [shape: f32[8,24], index: 4, kind: input, shape index: {}]   ;;  %s1841_s5 = inlined_call_operand.vmem [shape: f32[8,1], index: 5, kind: input, shape index: {}]   ;;  %s1842_s6 = inlined_call_operand.vmem [shape: f32[8,8], index: 6, kind: input, shape index: {}]   ;;  %s1843_s7 = inlined_call_operand.vmem [shape: f32[8,1], index: 7, kind: input, shape index: {}]   ;;  %s1844_s8 = inlined_call_operand.hbm [shape: f32[2,8,512], index: 8, kind: output, shape index: {}]  }
   0x1   :  { %1865 = sst [smem:[#allocation27_spill]] %s1836_s0 }
   0x2   :  { %1866 = sst [smem:[#allocation28_spill]] %s1837_s1 }
   0x3   :  { %1867 = sst [smem:[#allocation29_spill]] %s1838_s2 }
   0x4   :  { %1868 = sst [smem:[#allocation30_spill]] %s1839_s3 }
   0x5   :  { %1869 = sst [smem:[#allocation31_spill]] %s1840_s4 }
   0x6   :  { %1870 = sst [smem:[#allocation32_spill]] %s1841_s5 }
   0x7   :  { %1871 = sst [smem:[#allocation33_spill]] %s1842_s6 }
   0x8   :  { %1872 = sst [smem:[#allocation34_spill]] %s1843_s7 }
   0x9   :  { %1873 = sst [smem:[#allocation35_spill]] %s1844_s8 }
   0xa   :  { %13 = vsyncpa [#allocation5], 0 }
   0xb   :  { %15 = vsyncpa [#allocation5 + $0x1], 0 }
   0xc   :  { %16 = vsyncpa [#allocation8], 0 }
   0xd   :  { %18 = vsyncpa [#allocation8 + $0x1], 0 }
   0xe   :  { %19 = vsyncpa [#allocation6], 0 }
   0xf   :  { %21 = vsyncpa [#allocation6 + $0x1], 0  ;;  %s1371_s27 = smov 0   ;;  %s1373_s28 = smov 0  }
  0x10   :  { %s1375_s29 = smov 0   ;;  %s1377_s30 = smov 0  }
  0x11   :  { %s1379_s9 = smov 0   ;;  %s1381_s10 = smov 0  }
  0x12   :  { %s1383_s11 = smov 0   ;;  %s1385_s12 = smov 0  }
  0x13   :  { %s1387_s13 = smov 0   ;;  %s1389_s14 = smov 0  }
  0x14   :  { %s1391_s15 = smov 0   ;;  %s1393_s16 = smov 0  }
  0x15   :  { %s1395_s17 = smov 0   ;;  %s1397_s18 = smov 0  }
  0x16 LB: > { %1874 = sst [smem:[#allocation15_spill]] %s1259_s27  ;;  %s1442_s19 = sadd.s32 4294967295, %s1311_s18   ;;  %s1311_s18 = sphi %s1397_s18, %s27_s18   ;;  %s1307_s17 = sphi %s1395_s17, %s1950_s17   ;;  %s1303_s16 = sphi %s1393_s16, %s1949_s16   ;;  %s1299_s15 = sphi %s1391_s15, %s1939_s15   ;;  %s1295_s14 = sphi %s1389_s14, %s1948_s14   ;;  %s1291_s13 = sphi %s1387_s13, %s1947_s13   ;;  %s1287_s12 = sphi %s1385_s12, %s1946_s12   ;;  %s1283_s11 = sphi %s1383_s11, %s1945_s11   ;;  %s1279_s10 = sphi %s1381_s10, %s1944_s10   ;;  %s1275_s9 = sphi %s1379_s9, %s1943_s9   ;;  %s1271_s30 = sphi %s1377_s30, %s1936_s30   ;;  %s1267_s29 = sphi %s1375_s29, %s1942_s29   ;;  %s1263_s28 = sphi %s1373_s28, %s1935_s28   ;;  %s1259_s27 = sphi %s1371_s27, %s1934_s27  }
  0x17   : > { %1875 = sst [smem:[#allocation16_spill]] %s1263_s28  ;;  %s1445_s20 = sadd.s32 1, %s1303_s16 }
  0x18   : > { %1876 = sst [smem:[#allocation17_spill]] %s1267_s29  ;;  %p37_p0 = scmp.ge.s32.totalorder %s1445_s20, 4 }
  0x19   : > { %1877 = sst [smem:[#allocation18_spill]] %s1275_s9  ;;  %s39_s21 = sadd.s32 1, %s1307_s17 }
  0x1a   : > { %1878 = sst [smem:[#allocation19_spill]] %s1295_s14  ;;  %p1857_p1 = scmp.eq.s32.totalorder %s1311_s18, 0 }
  0x1b   : > { %1879 = sst [smem:[#allocation20_spill]] %s1299_s15  ;;  %p1856_p2 = scmp.eq.s32.totalorder %s1442_s19, 0 }
  0x1c   : > { %1880 = sst [smem:[#allocation21_spill]] %s1303_s16  ;;  %s1952_s21 = smov (!%p37_p0, %s39_s21), %s1307_s17 }
  0x1d   : > { %1881 = sst [smem:[#allocation22_spill]] %s1307_s17  ;;  %s862_s24 = sadd.s32 4294967295, %s1303_s16 }
  0x1e   : > { %s1452_s22 = scalar_select %p37_p0, 0, %s1445_s20  }
  0x1f   : > { %p41_p3 = scmp.ge.s32.totalorder %s1952_s21, 2  ;;  %p72_p4 = scmp.gt.s32.totalorder %s862_s24, 0 }
  0x20   : > { %1882 = sst [smem:[#allocation23_spill]] %s1452_s22  ;;  %s44_s23 = ssub.s32 %s1303_s16, %s1452_s22 }
  0x21   : > { %s863_s25 = sadd.s32 4294967295, %s1452_s22  ;;  %s82_s26 = sadd.s32 1, %s1279_s10 }
  0x22   : > { %s1954_s21 = smov (%p41_p3, %s1952_s21), 0  ;;  %s1956_s24 = smov (!%p72_p4, %s862_s24), 0 }
  0x23   : > { %1883 = sst [smem:[#allocation24_spill]] %s1954_s21  ;;  %s1464_s8 = ssub.s32 %s1307_s17, %s1954_s21 }
  0x24   : > { %p75_p5 = scmp.gt.s32.totalorder %s863_s25, 0  ;;  %s1467_s6 = sor.u32 %s44_s23, %s1464_s8 }
  0x25   : > { %p89_p6 = scmp.ne.s32.totalorder %s1279_s10, %s1275_s9  ;;  %p95_p8 = scmp.ne.s32.totalorder %s1275_s9, %s1271_s30 }
  0x26   : > { %s1958_s25 = smov (!%p75_p5, %s863_s25), 0  ;;  %p1855_p11 = scmp.lt.s32.totalorder %s1311_s18, 8 }
  0x27   : > { %p1476_p9 = por %p89_p6, %p1857_p1  ;;  %p1482_p10 = por %p95_p8, %p1856_p2 }
  0x28   : > { %s78_s4 = ssub.s32 %s1956_s24, %s1958_s25  ;;  %s1489_s30 = sshll.u32 %s1307_s17, 2 }
  0x29   : > { %s1885_s21 = scalar_select %p1482_p10, 1, 0 }
  0x2a   : > { %s79_s23 = sor.u32 %s78_s4, %s1464_s8  ;;  %s325_s5 = sand.u32 1, %s1311_s18  }
  0x2b   : > { %1886 = sst [smem:[#allocation25_spill]] %s1885_s21  ;;  %p80_p12 = scmp.eq.s32.totalorder %s79_s23, 0 }
  0x2c   : > { %s327_s3 = sand.u32 1, %s1279_s10   ;;  %s337_s9 = sadd.s32 %s1489_s30, %s1956_s24 }
  0x2d   : > { %s1494_s14 = scalar_select %p80_p12, %s1279_s10, %s82_s26  }
  0x2e   : > { %s869_s15 = sshll.u32 %s327_s3, 3  ;;  %s872_s2 = sshll.u32 %s337_s9, 7 }
  0x2f   : > { %s329_s27 = scalar_lea.vmem [#allocation7], %s869_s15  ;;  %s1887_s1 = sld [smem:[#allocation28_spill]] }
  0x30   : > { %s341_s21 = sshll.u32 %s329_s27, 4  ;;  %p1508_p13 = pnand %p1855_p11, %p1476_p9  ;;  %s1502_s21 = int_to_ptr.vmem [resolvable:$true] %s341_s21 }
  0x31   : > { %s1514_s3 = scalar_lea.sflag [#allocation8], %s325_s5 }
  0x32   : > { %p1069_p5 = pneg %p1508_p13 }
  0x35   : > { %s1500_s25 = scalar_lea.hbm %s1887_s1, %s872_s2  ;;  %s1072_s28 = scalar_lea.hbm %s1887_s1, 1024 }
  0x36   : > { %s1067_s2 = scalar_lea.hbm %s1500_s25, 128  ;;  %p1073_p9 = scmp.lt.u32.totalorder %s1500_s25, %s1887_s1 }
  0x37   : > { %p1068_p4 = scmp.ne.s32.totalorder %s1500_s25, %s1067_s2  ;;  %p1074_p12 = scmp.lt.u32.totalorder %s1072_s28, %s1067_s2 }
  0x38   : > { %p1076_p2 = scmp.lt.u32.totalorder %s1067_s2, %s1500_s25 }
  0x39   : > { %p1070_p6 = pnand %p1069_p5, %p1068_p4  ;;  %p1075_p11 = por %p1074_p12, %p1073_p9 }
  0x3b   : > { %p1071_p8 = pneg %p1070_p6  ;;  %p1077_p1 = por %p1076_p2, %p1075_p11 }
  0x3d   : > { %p1078_p7 = pnand %p1077_p1, %p1071_p8 }
  0x3f   : > { %1081 = shalt.err (!%p1078_p7)
}
  0x40   : > { %s1082_s5 = scalar_lea.vmem %s1502_s21, 128  ;;  %s1313_s15 = smov [#allocation7]  }
  0x41   : > { %p1083_p4 = scmp.ne.s32.totalorder %s1502_s21, %s1082_s5  ;;  %s1087_s24 = sshll.u32 %s1313_s15, 4  ;;  %s1088_s24 = int_to_ptr.vmem [resolvable:$false] %s1087_s24 }
  0x42   : > { %s1089_s26 = scalar_lea.vmem %s1088_s24, 256  ;;  %p1090_p3 = scmp.lt.s32.totalorder %s1502_s21, %s1088_s24 }
  0x43   : > { %p1085_p6 = pnand %p1083_p4, %p1069_p5  ;;  %p1091_p9 = scmp.lt.s32.totalorder %s1089_s26, %s1082_s5 }
  0x45   : > { %p1086_p0 = pneg %p1085_p6  ;;  %p1092_p12 = por %p1091_p9, %p1090_p3 }
  0x47   : > { %p1093_p2 = pnand %p1092_p12, %p1086_p0 }
  0x49   : > { %1096 = shalt.err (!%p1093_p2)
}
  0x4a   : > { %929 = dma.hbm_to_vmem [thread:$0]  (!%p1508_p13), %s1500_s25, 128, %s1502_s21, %s1514_s3  }
  0x4b   : > { %p1889_p1 = scmp.lt.s32.totalorder %s1311_s18, 9  ;;  %p1890_p7 = scmp.ge.s32.totalorder %s1311_s18, 1 }
  0x4c   : > { %s861_s4 = sadd.s32 4294967294, %s1311_s18   ;;  %s48_s2 = sadd.s32 1, %s1291_s13 }
  0x4d   : > { %p1546_p11 = pnand %p1890_p7, %p1889_p1  ;;  %p55_p0 = scmp.ne.s32.totalorder %s1291_s13, %s1287_s12 }
  0x4e   : > { %p1892_p3 = scmp.eq.s32.totalorder %s1467_s6, 0  ;;  %p1894_p5 = scmp.eq.s32.totalorder %s1311_s18, 0 }
  0x4f   : > { %p61_p13 = scmp.ne.s32.totalorder %s1287_s12, %s1283_s11  ;;  %p267_p4 = scmp.eq.s32.totalorder %s1442_s19, 7 }
  0x50   : > { %s1557_s7 = scalar_select %p1892_p3, %s1291_s13, %s48_s2  }
  0x51   : > { %p1561_p8 = por %p1894_p5, %p55_p0  ;;  %p273_p6 = scmp.eq.s32.totalorder %s861_s4, 7 }
  0x52   : > { %1893 = sst [smem:[#allocation26_spill]] %s1557_s7  ;;  %p1896_p9 = scmp.eq.s32.totalorder %s1442_s19, 0 }
  0x53   : > { %s305_s25 = sand.u32 1, %s1291_s13   ;;  %p1575_p2 = por %p267_p4, %p55_p0 }
  0x54   : > { %p1570_p12 = por %p1896_p9, %p61_p13  ;;  %p1579_p1 = por %p273_p6, %p61_p13 }
  0x55   : > { %s1898_s6 = scalar_select %p1575_p2, 1, 0 }
  0x56   : > { %s1897_s21 = scalar_select %p1570_p12, 1, 0 }
  0x57   : > { %s1899_s28 = scalar_select %p1579_p1, 1, 0 }
  0x58   : > { %s866_s29 = sshll.u32 %s305_s25, 3  ;;  %s314_s9 = sadd.s32 %s1303_s16, %s1489_s30 }
  0x59   : > { %s868_s5 = sshll.u32 %s314_s9, 7  ;;  %s309_s15 = scalar_lea.vmem [#allocation4], %s866_s29 }
  0x5a   : > { %s318_s24 = sshll.u32 %s309_s15, 4  ;;  %s1900_s0 = sld [smem:[#allocation27_spill]]  ;;  %s1590_s24 = int_to_ptr.vmem [resolvable:$true] %s318_s24 }
  0x5b   : > { %p1901_p7 = scmp.lt.s32.totalorder %s1311_s18, 8  ;;  %s306_s29 = scalar_lea.sflag [#allocation5], %s305_s25 }
  0x5d   : > { %p1596_p0 = pnand %p1901_p7, %p1561_p8 }
  0x5f   : > { %p1099_p5 = pneg %p1596_p0 }
  0x60   : > { %s1588_s2 = scalar_lea.hbm %s1900_s0, %s868_s5  ;;  %s1102_s27 = scalar_lea.hbm %s1900_s0, 1024 }
  0x61   : > { %s1097_s9 = scalar_lea.hbm %s1588_s2, 128  ;;  %p1103_p8 = scmp.lt.u32.totalorder %s1588_s2, %s1900_s0 }
  0x62   : > { %p1098_p3 = scmp.ne.s32.totalorder %s1588_s2, %s1097_s9  ;;  %p1104_p6 = scmp.lt.u32.totalorder %s1102_s27, %s1097_s9 }
  0x63   : > { %p1106_p7 = scmp.lt.u32.totalorder %s1097_s9, %s1588_s2 }
  0x64   : > { %p1100_p13 = pnand %p1099_p5, %p1098_p3  ;;  %p1105_p9 = por %p1104_p6, %p1103_p8 }
  0x66   : > { %p1101_p4 = pneg %p1100_p13  ;;  %p1107_p1 = por %p1106_p7, %p1105_p9 }
  0x68   : > { %p1108_p2 = pnand %p1107_p1, %p1101_p4 }
  0x6a   : > { %1111 = shalt.err (!%p1108_p2)
}
  0x6b   : > { %s1112_s25 = scalar_lea.vmem %s1590_s24, 128  ;;  %s1314_s5 = smov [#allocation4]  }
  0x6c   : > { %p1113_p3 = scmp.ne.s32.totalorder %s1590_s24, %s1112_s25  ;;  %s1117_s15 = sshll.u32 %s1314_s5, 4  ;;  %s1118_s15 = int_to_ptr.vmem [resolvable:$false] %s1117_s15 }
  0x6d   : > { %s1119_s26 = scalar_lea.vmem %s1118_s15, 256  ;;  %p1120_p12 = scmp.lt.s32.totalorder %s1590_s24, %s1118_s15 }
  0x6e   : > { %p1115_p13 = pnand %p1113_p3, %p1099_p5  ;;  %p1121_p8 = scmp.lt.s32.totalorder %s1119_s26, %s1112_s25 }
  0x70   : > { %p1116_p10 = pneg %p1115_p13  ;;  %p1122_p6 = por %p1121_p8, %p1120_p12 }
  0x72   : > { %p1123_p9 = pnand %p1122_p6, %p1116_p10 }
  0x74   : > { %1126 = shalt.err (!%p1123_p9)
}
  0x75   : > { %s1903_s9 = sld [smem:[#allocation17_spill]]  ;;  %s1904_s27 = sld [smem:[#allocation16_spill]] }
  0x76   : > { %s1905_s4 = sld [smem:[#allocation15_spill]]  ;;  %p106_p10 = scmp.lt.s32.totalorder %s1445_s20, 3 }
  0x77   : > { %926 = dma.hbm_to_vmem [thread:$0]  (!%p1596_p0), %s1588_s2, 128, %s1590_s24, %s306_s29  }
  0x78   : > { %s108_s25 = sadd.s32 1, %s1452_s22  ;;  %s1960_s20 = smov (!%p106_p10, %s1445_s20), 3 }
  0x79   : > { %p109_p12 = scmp.lt.s32.totalorder %s108_s25, 3  ;;  %p1906_p5 = scmp.eq.s32.totalorder %s1311_s18, 0 }
  0x7a   : > { %p1907_p3 = scmp.eq.s32.totalorder %s1442_s19, 0  ;;  %s360_s29 = sadd.s32 %s1489_s30, %s1960_s20 }
  0x7b   : > { %s116_s1 = sadd.s32 1, %s1903_s9  ;;  %s1962_s25 = smov (!%p109_p12, %s108_s25), 3 }
  0x7c   : > { %p123_p2 = scmp.ne.s32.totalorder %s1903_s9, %s1904_s27  ;;  %p129_p1 = scmp.ne.s32.totalorder %s1904_s27, %s1905_s4 }
  0x7d   : > { %s112_s5 = ssub.s32 %s1960_s20, %s1962_s25  ;;  %s350_s15 = sand.u32 1, %s1903_s9  }
  0x7e   : > { %s113_s26 = sor.u32 %s112_s5, %s1464_s8  ;;  %p125_p4 = por %p123_p2, %p1906_p5 }
  0x7f   : > { %p114_p7 = scmp.eq.s32.totalorder %s113_s26, 0  ;;  %p1639_p13 = por %p129_p1, %p1907_p3 }
  0x80   : > { %s873_s2 = sshll.u32 %s350_s15, 3  ;;  %s875_s0 = sshll.u32 %s360_s29, 7 }
  0x81   : > { %s1908_s24 = scalar_select %p1639_p13, 1, 0 }
  0x82   : > { %s1964_s9 = smov (!%p114_p7, %s1903_s9), %s116_s1  ;;  %s1909_s16 = sld [smem:[#allocation29_spill]] }
  0x83   : > { %s352_s8 = scalar_lea.vmem [#allocation9], %s873_s2  ;;  %p1911_p0 = scmp.lt.s32.totalorder %s1311_s18, 8 }
  0x84   : > { %s364_s4 = sshll.u32 %s352_s8, 4  ;;  %s1652_s4 = int_to_ptr.vmem [resolvable:$true] %s364_s4 }
  0x85   : > { %p1656_p8 = pnand %p1911_p0, %p125_p4 }
  0x87   : > { %p1129_p9 = pneg %p1656_p8 }
  0x88   : > { %s1910_s7 = smov %s1909_s16  ;;  %s1650_s27 = scalar_lea.hbm %s1909_s16, %s875_s0 }
  0x89   : > { %s1127_s20 = scalar_lea.hbm %s1650_s27, 128  ;;  %s1132_s17 = scalar_lea.hbm %s1910_s7, 1024 }
  0x8a   : > { %p1128_p6 = scmp.ne.s32.totalorder %s1650_s27, %s1127_s20  ;;  %p1133_p2 = scmp.lt.u32.totalorder %s1650_s27, %s1910_s7 }
  0x8b   : > { %p1134_p1 = scmp.lt.u32.totalorder %s1132_s17, %s1127_s20  ;;  %p1136_p4 = scmp.lt.u32.totalorder %s1127_s20, %s1650_s27 }
  0x8c   : > { %p1130_p10 = pnand %p1129_p9, %p1128_p6 }
  0x8d   : > { %p1135_p5 = por %p1134_p1, %p1133_p2 }
  0x8e   : > { %p1131_p12 = pneg %p1130_p10 }
  0x8f   : > { %p1137_p7 = por %p1136_p4, %p1135_p5 }
  0x91   : > { %p1138_p3 = pnand %p1137_p7, %p1131_p12 }
  0x93   : > { %1141 = shalt.err (!%p1138_p3)
}
  0x94   : > { %s1142_s1 = scalar_lea.vmem %s1652_s4, 128  ;;  %s1315_s5 = smov [#allocation9]  }
  0x95   : > { %p1143_p0 = scmp.ne.s32.totalorder %s1652_s4, %s1142_s1  ;;  %s1147_s15 = sshll.u32 %s1315_s5, 4  ;;  %s1148_s15 = int_to_ptr.vmem [resolvable:$false] %s1147_s15 }
  0x96   : > { %s1149_s26 = scalar_lea.vmem %s1148_s15, 256  ;;  %p1150_p13 = scmp.lt.s32.totalorder %s1652_s4, %s1148_s15 }
  0x97   : > { %p1145_p6 = pnand %p1143_p0, %p1129_p9  ;;  %p1151_p2 = scmp.lt.s32.totalorder %s1149_s26, %s1142_s1 }
  0x99   : > { %p1146_p10 = pneg %p1145_p6  ;;  %p1152_p1 = por %p1151_p2, %p1150_p13 }
  0x9b   : > { %p1153_p5 = pnand %p1152_p1, %p1146_p10 }
  0x9d   : > { %1156 = shalt.err (!%p1153_p5)
}
  0x9e   : > { %932 = dma.hbm_to_vmem [thread:$0]  (!%p1656_p8), %s1650_s27, 128, %s1652_s4, %s1514_s3  }
  0x9f   : > { %383 = sbr.rel (%p1546_p11) target bundleno = 906 (0x38a), region = 52  ;;  %s1689_s2 = sand.u32 (!%p1546_p11), 1, %s1287_s12  }
  0xa0   : > { %s877_s29 = sshll.u32 (!%p1546_p11), %s1689_s2, 3  ;;  %s386_s8 = scalar_lea.sflag (!%p1546_p11), [#allocation5], %s1689_s2 }
  0xa1   : > { %s1695_s20 = scalar_lea.vmem (!%p1546_p11), [#allocation4], %s877_s29  ;;  %p1913_p13 = scmp.ne.s32.totalorder (!%p1546_p11), %s1897_s21, 0 }
  0xa6   : > { %1242 = dma.done.wait (%p1913_p13), %s386_s8, 128  }
  0xa7   : > { %1244 = vsyncadd (%p1913_p13), %s386_s8, 4294967168  ;;  %s1914_s3 = sld [smem:[#allocation18_spill]]  ;;  %s1915_s23 = sld [smem:[#allocation25_spill]] }
  0xa8   : > { %s394_s27 = sand.u32 1, %s1442_s19  }
  0xa9   : > { %s395_s0 = scalar_lea.sflag [#allocation8], %s394_s27 }
  0xad   : > { %s396_s4 = sand.u32 1, %s1914_s3   ;;  %p1916_p11 = scmp.ne.s32.totalorder %s1915_s23, 0 }
  0xae   : > { %s878_s25 = sshll.u32 %s396_s4, 3 }
  0xaf   : > { %s398_s16 = scalar_lea.vmem [#allocation7], %s878_s25 }
  0xb0   : > { %1246 = dma.done.wait (%p1916_p11), %s395_s0, 128  }
  0xb1   : > { %1248 = vsyncadd (%p1916_p11), %s395_s0, 4294967168  ;;  %s1917_s17 = sld [smem:[#allocation16_spill]]  ;;  %p1918_p8 = scmp.ne.s32.totalorder %s1908_s24, 0 }
  0xb7   : > { %s405_s22 = sand.u32 1, %s1917_s17  }
  0xb8   : > { %s879_s30 = sshll.u32 %s405_s22, 3 }
  0xb9   : > { %s407_s1 = scalar_lea.vmem [#allocation9], %s879_s30 }
  0xba   : > { %1250 = dma.done.wait (%p1918_p8), %s395_s0, 128  }
  0xbb   : > { %1252 = vsyncadd (%p1918_p8), %s395_s0, 4294967168  ;;  %s1919_s19 = sld [smem:[#allocation20_spill]]  ;;  %s1920_s21 = sld [smem:[#allocation19_spill]]  ;;  %v470_v0 = vld [vmem:[%s398_s16] sm:$0xff]  ;;  %v472_v1 = vld [vmem:[%s1695_s20] sm:$0xff] }
  0xbc   : > { %s1921_s23 = sld [smem:[#allocation30_spill]]  ;;  %v476_v2 = vld [vmem:[%s407_s1] sm:$0xff]  ;;  %471 = vst [vmem:[#allocation2] sm:$0xff] %v470_v0  ;;  %473 = vst [vmem:[#allocation2 + $0x8] sm:$0xff] %v472_v1  ;;  %s1725_s24 = scalar_lea.vmem [#allocation10], %s877_s29 }
  0xbd   : > { %475 = vst [vmem:[#allocation3] sm:$0xff] %v472_v1  ;;  %477 = vst [vmem:[#allocation3 + $0x8] sm:$0xff] %v476_v2 }
  0xc1   : > { %p463_p9 = scmp.lt.s32.totalorder %s1919_s19, 1  ;;  %p465_p12 = scmp.lt.s32.totalorder %s1920_s21, 3 }
  0xc2   : > { %p882_p4 = scmp.ne.s32.totalorder %s1920_s21, 0 }
  0xc3   : > { %s1966_s19 = smov (!%p463_p9, %s1919_s19), 1  ;;  %vm482_vm0 = vcmask (!%p882_p4), 1048560   ;;  %v1316_v3 = vmov (!%p882_p4), 0.0  }
  0xc4   : > { %s466_s5 = scalar_select %p465_p12, %s1920_s21, 3 }
  0xc5   : > { %s881_s15 = sshll.u32 %s1966_s19, 2  ;;  %481 = sbr.rel (%p882_p4) target bundleno = 204 (0xcc), region = 68  ;;  %483 = vst.msk [vmem:[#allocation2] sm:$0xff] (!%p882_p4), %vm482_vm0, %v1316_v3 }
  0xc6   : > { %s1716_s26 = sadd.s32 %s881_s15, %s466_s5 }
  0xc7   : > { %s469_s27 = scalar_lea.vmem %s1921_s23, %s1716_s26 }
  0xcc PF: > { %s1922_s4 = sld [smem:[#allocation19_spill]] }
  0xd2   : > { %p883_p7 = scmp.ne.s32.totalorder %s1922_s4, 3 }
  0xd3   : > { %vm488_vm1 = vcmask (!%p883_p7), 15360   ;;  %v1317_v4 = vmov (!%p883_p7), 0.0  }
  0xd4   : > { %487 = sbr.rel (%p883_p7) target bundleno = 219 (0xdb), region = 72  ;;  %489 = vst.msk [vmem:[#allocation3 + $0x8] sm:$0xff] (!%p883_p7), %vm488_vm1, %v1317_v4 }
  0xdb PF: > { %v1730_v5 = vld [vmem:[%s1695_s20] sm:$0xff]  ;;  %v494_v6 = vld [vmem:[#allocation3 + $0x8] sm:$0xff]  ;;  %s1318_s29 = smov 126   ;;  %s1319_s25 = smov 124   ;;  %v493_v9 = vld [vmem:[#allocation3] sm:$0xff]  ;;  %v1321_v11 = vmov 0.0|0.0  }
  0xdc   : > { %496 = vrot.lane.b32.xlu0 %v1730_v5, %s1318_s29  ;;  %502 = vrot.lane.b32.xlu1 %v494_v6, %s1319_s25  ;;  %v491_v7 = vld [vmem:[#allocation2] sm:$0xff]  ;;  %v492_v8 = vld [vmem:[#allocation2 + $0x8] sm:$0xff]  ;;  %s1320_s0 = smov 2   ;;  %v1322_v12 = vmov 0.0   ;;  %vm1323_vm2 = vmmov 0   ;;  %v1324_v13 = vmov 0  }
  0xdd   : > { %v1060_v10 = vpack.i.bf16 %v492_v8, %v491_v7  ;;  %912 = vmatprep.subr.bf16.mxu0 %v1321_v11  ;;  %907 = vmatprep.subr.mxu1 %v1322_v12  ;;  %vm504_vm3 = vcmask 1014784   ;;  %s1923_s17 = sld [smem:[#allocation32_spill]]  ;;  %vm525_vm4 = vcmask 15360   ;;  %s1924_s1 = sld [smem:[#allocation31_spill]]  ;;  %vm531_vm5 = vcmask 195584  }
  0xde   : > { %904 = vmatprep.mubr.msk.f32.mxu0 %vm1323_vm2, %v1322_v12  ;;  %909 = vmatprep.mubr.msk.f32.mxu1 %vm1323_vm2, %v1322_v12  ;;  %s1925_s19 = sld [smem:[#allocation20_spill]]  ;;  %s1926_s21 = sld [smem:[#allocation19_spill]]  ;;  %vm613_vm6 = vcmask 64512   ;;  %v886_v40 = vld [vmem:[%s469_s27] ss:$0 sm:$0xff] }
  0xdf   : > { %1065 = vset.pattern.permute.xlu1 %v1324_v13  ;;  %1066 = vset.pattern.permute.xlu0 %v1324_v13  ;;  %s1927_s8 = sld [smem:[#allocation34_spill]]  ;;  %s1928_s4 = sld [smem:[#allocation33_spill]] }
  0xe0   : > { %500 = vrot.lane.b32.xlu0 %v493_v9, %s1319_s25  ;;  %1061 = vrot.lane.b32.xlu1 %v1060_v10, %s1320_s0  ;;  %s713_s22 = sshll.u32 %s1725_s24, 4  ;;  %s1930_s5 = sld [smem:[#allocation35_spill]]  ;;  %s1759_s22 = int_to_ptr.vmem [resolvable:$true] %s713_s22 }
  0xe1   : > { %s1157_s15 = scalar_lea.vmem %s1759_s22, 128  ;;  %p1931_p0 = scmp.ne.s32.totalorder %s1898_s6, 0 }
  0xe2   : > { %p1158_p3 = scmp.ne.s32.totalorder %s1759_s22, %s1157_s15  ;;  %s1325_s26 = smov [#allocation10]  }
  0xe3   : > { %v507_v18 = vld [vmem:[%s1923_s17] sm:$0xff]  ;;  %s1161_s27 = sshll.u32 %s1325_s26, 4  ;;  %s1162_s27 = int_to_ptr.vmem [resolvable:$false] %s1161_s27 }
  0xe4   : > { %v506_v27 = vld [vmem:[%s1924_s1] sm:$0xff]  ;;  %s888_s29 = sshll.u32 %s1925_s19, 2  ;;  %p1159_p6 = pnand %p1158_p3, %p1931_p0 }
  0xe5   : > { %v607_v29 = vld [vmem:[%s1927_s8] sm:$0xff]  ;;  %s709_s25 = sadd.s32 %s1926_s21, %s888_s29  ;;  %s698_s21 = scalar_lea.sflag [#allocation6], %s1689_s2 }
  0xe6   : > { %v606_v35 = vld [vmem:[%s1928_s4] sm:$0xff]  ;;  %s889_s17 = sshll.u32 %s709_s25, 7  ;;  %p1160_p10 = pneg %p1159_p6 }
  0xe7   : > { %s1757_s19 = scalar_lea.hbm %s1930_s5, %s889_s17  ;;  %s1163_s8 = scalar_lea.vmem %s1162_s27, 256 }
  0xe8   : > { %p1164_p2 = scmp.lt.s32.totalorder %s1759_s22, %s1162_s27  ;;  %p1165_p1 = scmp.lt.s32.totalorder %s1163_s8, %s1157_s15 }
  0xea   : > { %p1166_p5 = por %p1165_p1, %p1164_p2 }
  0xec   : > { %p1167_p13 = pnand %p1166_p5, %p1160_p10 }
 0x14e   : > { %v497_v14 = vpop.permute.xlu0 %496  ;;  %v503_v15 = vpop.permute.xlu1 %502 }
 0x14f   : > { %519 = vrot.lane.b32.xlu0 %v497_v14, %s1320_s0 }
 0x152   : > { %v501_v16 = vpop.permute.xlu0 %500  ;;  %v1062_v19 = vpop.permute.xlu1 %1061 }
 0x153   : > { %521 = vrot.lane.b32.xlu1 %v501_v16, %s1320_s0  ;;  %v505_v17 = vsel %vm504_vm3, %v501_v16, %v503_v15  ;;  %v1064_v20 = vunpack.i.h.bf16 %v1062_v19  ;;  %v1063_v21 = vunpack.i.l.bf16 %v1062_v19 }
 0x154   : > { %523 = vrot.lane.b32.xlu0 %v505_v17, %s1320_s0 }
 0x155   : > { %v526_v22 = vsel %vm525_vm4, %v1063_v21, %v1064_v20 }
 0x157   : > { %510 = vperm.xlu1 %1065, %v507_v18  }
 0x158   : > { %610 = vperm.xlu0 %1066, %v607_v29  }
 0x1c1   : > { %v520_v23 = vpop.permute.xlu0 %519 }
 0x1c2   : > { %v913_v24 = vpack.c.bf16 %v520_v23, %v526_v22 }
 0x1c4   : > { %914 = vmatpush3.bf16.msra.mxu0 %v913_v24 }
 0x1c5   : > { %v522_v25 = vpop.permute.xlu1 %521  ;;  %902 = vmatprep.subr.mxu0 %v1322_v12 }
 0x1c6   : > { %v524_v26 = vpop.permute.xlu0 %523 }
 0x1c7   : > { %v527_v28 = vsel %vm525_vm4, %v522_v25, %v524_v26 }
 0x1c8   : > { %903 = vmatpush3.msra.mxu0 %v527_v28 }
 0x1c9   : > { %905 = vmatmul.mubr.msk.f32.vlgmr.msra.gmra.mrb[0].mxu0 %vm531_vm5, %v506_v27 }
 0x1d6   : > { %v511_v30 = vpop.permute.xlu1 %510 }
 0x1d7   : > { %v611_v36 = vpop.permute.xlu0 %610 }
 0x29c   : > { %v601_v31 = vpop.f32.mrb[0].mxu0 }
 0x29d   : > { %v602_v32 = vadd.f32 %v601_v31, %v511_v30  ;;  %v906_v33 = vpop.f32.mrb[1].mxu0 }
 0x29f   : > { %v605_v34 = vmax.f32 %v602_v32, 0.0 }
 0x2a1   : > { %908 = vmatpush3.msra.mxu1 %v605_v34 }
 0x2a2   : > { %910 = vmatmul.mubr.msk.f32.vlgmr.msra.gmra.mrb[0].mxu1 %vm613_vm6, %v606_v35 }
 0x375   : > { %v683_v37 = vpop.f32.mrb[0].mxu1 }
 0x376   : > { %v684_v38 = vadd.f32 %v683_v37, %v611_v36  ;;  %v911_v39 = vpop.f32.mrb[1].mxu1 }
 0x378   : > { %v687_v41 = vadd.f32 %v684_v38, %v1730_v5 }
 0x37a   : > { %v695_v42 = vmul.f32 %v886_v40, %v687_v41 }
 0x37c   : > { %696 = vst [vmem:[%s1725_s24] sm:$0xff] %v695_v42 }
 0x37d   : > { %1170 = shalt.err (!%p1167_p13)
}
 0x37e   : > { %s1171_s2 = scalar_lea.hbm %s1757_s19, 128  ;;  %s1175_s23 = scalar_lea.hbm %s1930_s5, 1024 }
 0x37f   : > { %p1172_p11 = scmp.ne.s32.totalorder %s1757_s19, %s1171_s2  ;;  %p1176_p12 = scmp.lt.u32.totalorder %s1757_s19, %s1930_s5 }
 0x380   : > { %p1177_p4 = scmp.lt.u32.totalorder %s1175_s23, %s1171_s2  ;;  %p1179_p3 = scmp.lt.u32.totalorder %s1171_s2, %s1757_s19 }
 0x381   : > { %p1173_p8 = pnand %p1172_p11, %p1931_p0 }
 0x382   : > { %p1178_p7 = por %p1177_p4, %p1176_p12 }
 0x383   : > { %p1174_p9 = pneg %p1173_p8 }
 0x384   : > { %p1180_p6 = por %p1179_p3, %p1178_p7 }
 0x386   : > { %p1181_p10 = pnand %p1180_p6, %p1174_p9 }
 0x388   : > { %1184 = shalt.err (!%p1181_p10)
}
 0x389   : > { %921 = dma.vmem_to_hbm [thread:$0]  (%p1931_p0), %s1759_s22, 128, %s1757_s19, %s698_s21  }
 0x38a PF: > { %p938_p2 = scmp.ge.s32.totalorder %s1311_s18, 2  ;;  %s725_s25 = sand.u32 1, %s1283_s11  }
 0x38b   : > { %p1932_p1 = scmp.ne.s32.totalorder %s1899_s28, 0  ;;  %s726_s0 = scalar_lea.sflag [#allocation6], %s725_s25 }
 0x38d   : > { %p934_p5 = pnand %p938_p2, %p1932_p1 }
 0x38f   : > { %1254 = dma.done.wait (!%p934_p5), %s726_s0, 128  }
 0x390   : > { %1256 = vsyncadd (!%p934_p5), %s726_s0, 4294967168  ;;  %s27_s18 = sadd.s32 1, %s1311_s18   ;;  %s1934_s27 = sld [smem:[#allocation16_spill]] }
 0x391   : > { %p1789_p13 = scmp.ge.s32.totalorder %s27_s18, 10   ;;  %s1935_s28 = sld [smem:[#allocation17_spill]] }
 0x392   : > { %s1936_s30 = sld [smem:[#allocation18_spill]]  ;;  %s1937_s6 = sld [smem:[#allocation26_spill]] }
 0x393   : > { %s1938_s16 = sld [smem:[#allocation21_spill]]  ;;  %s1939_s15 = sld [smem:[#allocation22_spill]] }
 0x394   : > { %s1940_s17 = sld [smem:[#allocation23_spill]]  ;;  %s1941_s22 = sld [smem:[#allocation24_spill]] }
 0x395   : > { %s1942_s29 = smov %s1964_s9  ;;  %s1943_s9 = smov %s1279_s10 }
 0x396   : > { %s1944_s10 = smov %s1494_s14  ;;  %s1945_s11 = smov %s1287_s12 }
 0x397   : > { %s1946_s12 = smov %s1291_s13  ;;  %26 = sbr.rel (!%p1789_p13) target bundleno = 22 (0x16), region = 132 }
 0x398   : > { %s1947_s13 = smov %s1937_s6 }
 0x399   : > { %s1948_s14 = smov %s1938_s16 }
 0x39a   : > { %s1949_s16 = smov %s1940_s17  ;;  %s1950_s17 = smov %s1941_s22 }
 0x39e   :  { %731 = vsyncpa [#allocation5], 1 }
 0x39f   :  { %733 = vsyncpa [#allocation5 + $0x1], 1 }
 0x3a0   :  { %734 = vsyncpa [#allocation8], 1 }
 0x3a1   :  { %736 = vsyncpa [#allocation8 + $0x1], 1 }
 0x3a2   :  { %737 = vsyncpa [#allocation6], 1 }
 0x3a3   :  { %739 = vsyncpa [#allocation6 + $0x1], 1 }

</bundles_post_ra>
